<compile_context>
chip_gen: v5e
topology: v5e:2x2
jax: 0.10.0
libtpu: 0.0.40
codegen_flags: <defaults>
</compile_context>

<pallas_src>
import functools
import math

import jax
import jax.numpy as jnp
from jax.experimental import pallas as pl
from jax.experimental.pallas import tpu as pltpu


def _round_up(a, b):
    return (a + b - 1) // b * b


def _ffn_kernel(*refs, has_mask, compute_dtype, inv_keep):
    if has_mask:
        x_ref, mask_ref, w1_ref, b1_ref, w2_ref, b2_ref, o_ref, acc_ref = refs
    else:
        x_ref, w1_ref, b1_ref, w2_ref, b2_ref, o_ref, acc_ref = refs
        mask_ref = None

    k = pl.program_id(1)

    @pl.when(k == 0)
    def _init():
        acc_ref[...] = jnp.zeros_like(acc_ref)

    # linear1 slice: (tm, D) @ (D, tk) -> (tm, tk), f32 accumulation on the MXU.
    h = jnp.dot(x_ref[...], w1_ref[...], preferred_element_type=jnp.float32)
    # bias + ReLU in f32 (elementwise in the hidden dim, so per-slice is exact).
    h = jnp.maximum(h + b1_ref[...], 0.0)

    # Inverted dropout: keep-mask (0/1) scaled by 1/(1-p), applied per slice.
    if mask_ref is not None:
        h = h * (mask_ref[...].astype(jnp.float32) * inv_keep)

    # Partial linear2 contribution of this hidden slice: (tm, tk) @ (tk, D).
    acc_ref[...] += jnp.dot(h.astype(compute_dtype), w2_ref[...],
                            preferred_element_type=jnp.float32)

    @pl.when(k == pl.num_programs(1) - 1)
    def _finalize():
        o_ref[...] = (acc_ref[...] + b2_ref[...]).astype(o_ref.dtype)


def feedforward(x, w1, b1, w2, b2, *, drop_prob=0.1, training=True,
                rng_key=None, block_rows=256, block_hidden=512,
                compute_dtype=jnp.bfloat16):
    """x: (..., model_dim). w1: (model_dim, hidden). w2: (hidden, model_dim)."""
    orig_shape = x.shape
    D = orig_shape[-1]
    N = math.prod(orig_shape[:-1])
    H = w1.shape[1]
    assert w1.shape == (D, H) and w2.shape == (H, D)
    assert block_rows % 8 == 0
    assert 0.0 <= drop_prob < 1.0

    # Row tiling: tm is a multiple of 8; rows padded so the grid divides evenly.
    tm = min(block_rows, _round_up(N, 8))
    Npad = _round_up(N, tm)
    # Hidden tiling: multiple of 128 when it divides H, else the full H.
    tk = block_hidden if (H % block_hidden == 0) else H

    x2 = x.reshape(N, D)
    if Npad != N:
        x2 = jnp.pad(x2, ((0, Npad - N), (0, 0)))
    x2 = x2.astype(compute_dtype)
    w1c = w1.astype(compute_dtype)
    w2c = w2.astype(compute_dtype)
    b1r = b1.reshape(1, H).astype(jnp.float32)
    b2r = b2.reshape(1, D).astype(jnp.float32)

    use_dropout = bool(training) and drop_prob > 0.0

    operands = [x2]
    in_specs = [pl.BlockSpec((tm, D), lambda i, k: (i, 0))]            # x tile
    if use_dropout:
        if rng_key is None:
            rng_key = jax.random.PRNGKey(0)
        # RNG stream differs from torch, but semantics (bernoulli keep-mask
        # + 1/(1-p) scaling) match nn.Dropout in training mode.
        keep = jax.random.bernoulli(rng_key, 1.0 - drop_prob, (Npad, H))
        operands.append(keep.astype(compute_dtype))                    # 0/1
        in_specs.append(pl.BlockSpec((tm, tk), lambda i, k: (i, k)))   # mask
    operands += [w1c, b1r, w2c, b2r]
    in_specs += [
        pl.BlockSpec((D, tk), lambda i, k: (0, k)),                    # W1 slice
        pl.BlockSpec((1, tk), lambda i, k: (0, k)),                    # b1 slice
        pl.BlockSpec((tk, D), lambda i, k: (k, 0)),                    # W2 slice
        pl.BlockSpec((1, D),  lambda i, k: (0, 0)),                    # b2
    ]

    grid = (Npad // tm, H // tk)

    itm = jnp.dtype(compute_dtype).itemsize
    out_itm = jnp.dtype(x.dtype).itemsize
    bytes_accessed = (Npad * D * itm            # x
                      + D * H * itm + H * D * itm   # W1, W2
                      + (H + D) * 4                 # biases
                      + Npad * D * out_itm          # output
                      + (Npad * H * itm if use_dropout else 0))
    cost = pl.CostEstimate(flops=4 * Npad * D * H, transcendentals=0,
                           bytes_accessed=int(bytes_accessed))

    # VMEM budget: double-buffered inputs/outputs + f32 accumulator + headroom.
    vmem_bytes = (2 * (tm * D * itm + D * tk * itm + tk * 4
                       + tk * D * itm + D * 4
                       + (tm * tk * itm if use_dropout else 0))
                  + 2 * tm * D * out_itm
                  + tm * D * 4
                  + (4 << 20))
    vmem_bytes = int(min(max(vmem_bytes, 16 << 20), 64 << 20))

    kernel = functools.partial(
        _ffn_kernel,
        has_mask=use_dropout,
        compute_dtype=compute_dtype,
        inv_keep=(1.0 / (1.0 - drop_prob)) if use_dropout else 1.0)

    out = pl.pallas_call(
        kernel,
        out_shape=jax.ShapeDtypeStruct((Npad, D), x.dtype),
        grid=grid,
        in_specs=in_specs,
        out_specs=pl.BlockSpec((tm, D), lambda i, k: (i, 0)),
        scratch_shapes=[pltpu.VMEM((tm, D), jnp.float32)],
        compiler_params=pltpu.CompilerParams(
            dimension_semantics=("parallel", "arbitrary"),
            vmem_limit_bytes=vmem_bytes),
        cost_estimate=cost,
    )(*operands)

    return out[:N].reshape(orig_shape)


def _init_params(key, model_dim, hidden):
    """Deterministic init matching nn.Linear's uniform(-1/sqrt(fan_in), ...)."""
    k1, k2, k3, k4 = jax.random.split(key, 4)
    lim1 = 1.0 / math.sqrt(model_dim)
    lim2 = 1.0 / math.sqrt(hidden)
    # stored pre-transposed: (in, out)
    w1 = jax.random.uniform(k1, (model_dim, hidden), jnp.float32, -lim1, lim1)
    b1 = jax.random.uniform(k2, (hidden,),           jnp.float32, -lim1, lim1)
    w2 = jax.random.uniform(k3, (hidden, model_dim), jnp.float32, -lim2, lim2)
    b2 = jax.random.uniform(k4, (model_dim,),        jnp.float32, -lim2, lim2)
    return w1, b1, w2, b2


if __name__ == "__main__":
    batch, seq, model_dim, hidden = 2, 8, 32, 64
    key = jax.random.PRNGKey(0)
    kx, kp, kd = jax.random.split(key, 3)
    x = jax.random.normal(kx, (batch, seq, model_dim), jnp.float32)
    w1, b1, w2, b2 = _init_params(kp, model_dim, hidden)

    # Training-mode forward (dropout active), like the PyTorch module default.
    out_train = feedforward(x, w1, b1, w2, b2, drop_prob=0.1, training=True,
                            rng_key=kd)
    jax.block_until_ready(out_train)
    assert out_train.shape == x.shape
    assert bool(jnp.all(jnp.isfinite(out_train)))

    # Eval-mode (dropout = identity) correctness vs. a reference using the same
    # bf16-input / f32-accumulate math as the kernel.
    out_eval = feedforward(x, w1, b1, w2, b2, drop_prob=0.1, training=False)
    jax.block_until_ready(out_eval)
    cd = jnp.bfloat16
    xr = x.reshape(-1, model_dim)
    h_ref = jnp.dot(xr.astype(cd), w1.astype(cd),
                    preferred_element_type=jnp.float32) + b1
    h_ref = jnp.maximum(h_ref, 0.0)
    ref = (jnp.dot(h_ref.astype(cd), w2.astype(cd),
                   preferred_element_type=jnp.float32) + b2).reshape(x.shape)
    assert jnp.allclose(out_eval, ref, atol=1e-2, rtol=1e-2), \
        float(jnp.max(jnp.abs(out_eval - ref)))

    print("KERNEL_OK")
</pallas_src>

<mosaic_0001>
module attributes {stable_mosaic.version = 11 : i64} {
  func.func @_ffn_kernel(%arg0: i32, %arg1: i32, %arg2: memref<16x32xbf16, #tpu.memory_space<vmem>>, %arg3: memref<16x64xbf16, #tpu.memory_space<vmem>>, %arg4: memref<32x64xbf16, #tpu.memory_space<vmem>>, %arg5: memref<1x64xf32, #tpu.memory_space<vmem>>, %arg6: memref<64x32xbf16, #tpu.memory_space<vmem>>, %arg7: memref<1x32xf32, #tpu.memory_space<vmem>>, %arg8: memref<16x32xf32, #tpu.memory_space<vmem>>, %arg9: memref<16x32xf32, #tpu.memory_space<vmem>>) attributes {dimension_semantics = [#tpu.dimension_semantics<parallel>, #tpu.dimension_semantics<arbitrary>], iteration_bounds = array<i64: 1, 1>, scalar_prefetch = 0 : i64, scratch_operands = 1 : i64, tpu.core_type = #tpu.core_type<tc>, window_params = [{transform_indices = @transform_0, window_bounds = array<i64: 16, 32>}, {transform_indices = @transform_1, window_bounds = array<i64: 16, 64>}, {transform_indices = @transform_2, window_bounds = array<i64: 32, 64>}, {transform_indices = @transform_3, window_bounds = array<i64: 1, 64>}, {transform_indices = @transform_4, window_bounds = array<i64: 64, 32>}, {pipeline_mode = #tpu.pipeline_mode<synchronous>, transform_indices = @transform_5, window_bounds = array<i64: 1, 32>}, {transform_indices = @transform_6, window_bounds = array<i64: 16, 32>}]} {
    %c0_i32 = arith.constant 0 : i32
    %0 = arith.cmpi eq, %arg1, %c0_i32 : i32
    %1 = arith.extui %0 : i1 to i32
    %c0_i32_0 = arith.constant 0 : i32
    %2 = arith.cmpi ne, %1, %c0_i32_0 : i32
    scf.if %2 {
      %cst_19 = arith.constant 0.000000e+00 : f32
      %25 = vector.broadcast %cst_19 : f32 to vector<16x32xf32>
      %c0_20 = arith.constant 0 : index
      %c0_21 = arith.constant 0 : index
      %26 = vector.load %arg9[%c0_20, %c0_21] : memref<16x32xf32, #tpu.memory_space<vmem>>, vector<16x32xf32>
      tpu.vector_store %arg9[%c0_20, %c0_21], %25 {strides = array<i32>} : memref<16x32xf32, #tpu.memory_space<vmem>>, vector<16x32xf32>,
    } else {
    }
    %c0 = arith.constant 0 : index
    %c0_1 = arith.constant 0 : index
    %3 = vector.load %arg2[%c0, %c0_1] : memref<16x32xbf16, #tpu.memory_space<vmem>>, vector<16x32xbf16>
    %c0_2 = arith.constant 0 : index
    %c0_3 = arith.constant 0 : index
    %4 = vector.load %arg4[%c0_2, %c0_3] : memref<32x64xbf16, #tpu.memory_space<vmem>>, vector<32x64xbf16>
    %cst = arith.constant dense<0.000000e+00> : vector<16x64xf32>
    %5 = tpu.matmul %3, %4, %cst {dimension_numbers = #tpu.dot_dimension_numbers<[1], [0], [0], [1], [0, 0, 1, 1], [], []>} : vector<16x32xbf16>, vector<32x64xbf16>, vector<16x64xf32> -> vector<16x64xf32>
    %c0_4 = arith.constant 0 : index
    %c0_5 = arith.constant 0 : index
    %6 = vector.load %arg5[%c0_4, %c0_5] : memref<1x64xf32, #tpu.memory_space<vmem>>, vector<1x64xf32>
    %7 = vector.broadcast %6 : vector<1x64xf32> to vector<16x64xf32>
    %8 = arith.addf %5, %7 : vector<16x64xf32>
    %cst_6 = arith.constant 0.000000e+00 : f32
    %9 = vector.broadcast %cst_6 : f32 to vector<16x64xf32>
    %10 = arith.maximumf %8, %9 : vector<16x64xf32>
    %c0_7 = arith.constant 0 : index
    %c0_8 = arith.constant 0 : index
    %11 = vector.load %arg3[%c0_7, %c0_8] : memref<16x64xbf16, #tpu.memory_space<vmem>>, vector<16x64xbf16>
    %12 = arith.extf %11 : vector<16x64xbf16> to vector<16x64xf32>
    %cst_9 = arith.constant 1.11111116 : f32
    %13 = vector.broadcast %cst_9 : f32 to vector<16x64xf32>
    %14 = arith.mulf %12, %13 : vector<16x64xf32>
    %15 = arith.mulf %10, %14 : vector<16x64xf32>
    %c0_10 = arith.constant 0 : index
    %c0_11 = arith.constant 0 : index
    %16 = vector.load %arg9[%c0_10, %c0_11] : memref<16x32xf32, #tpu.memory_space<vmem>>, vector<16x32xf32>
    %17 = arith.truncf %15 : vector<16x64xf32> to vector<16x64xbf16>
    %c0_12 = arith.constant 0 : index
    %c0_13 = arith.constant 0 : index
    %18 = vector.load %arg6[%c0_12, %c0_13] : memref<64x32xbf16, #tpu.memory_space<vmem>>, vector<64x32xbf16>
    %cst_14 = arith.constant dense<0.000000e+00> : vector<16x32xf32>
    %19 = tpu.matmul %17, %18, %cst_14 {dimension_numbers = #tpu.dot_dimension_numbers<[1], [0], [0], [1], [0, 0, 1, 1], [], []>} : vector<16x64xbf16>, vector<64x32xbf16>, vector<16x32xf32> -> vector<16x32xf32>
    %20 = arith.addf %16, %19 : vector<16x32xf32>
    %c0_15 = arith.constant 0 : index
    %c0_16 = arith.constant 0 : index
    %21 = vector.load %arg9[%c0_15, %c0_16] : memref<16x32xf32, #tpu.memory_space<vmem>>, vector<16x32xf32>
    tpu.vector_store %arg9[%c0_15, %c0_16], %20 {strides = array<i32>} : memref<16x32xf32, #tpu.memory_space<vmem>>, vector<16x32xf32>,
    %c0_i32_17 = arith.constant 0 : i32
    %22 = arith.cmpi eq, %arg1, %c0_i32_17 : i32
    %23 = arith.extui %22 : i1 to i32
    %c0_i32_18 = arith.constant 0 : i32
    %24 = arith.cmpi ne, %23, %c0_i32_18 : i32
    scf.if %24 {
      %c0_19 = arith.constant 0 : index
      %c0_20 = arith.constant 0 : index
      %25 = vector.load %arg9[%c0_19, %c0_20] : memref<16x32xf32, #tpu.memory_space<vmem>>, vector<16x32xf32>
      %c0_21 = arith.constant 0 : index
      %c0_22 = arith.constant 0 : index
      %26 = vector.load %arg7[%c0_21, %c0_22] : memref<1x32xf32, #tpu.memory_space<vmem>>, vector<1x32xf32>
      %27 = vector.broadcast %26 : vector<1x32xf32> to vector<16x32xf32>
      %28 = arith.addf %25, %27 : vector<16x32xf32>
      %c0_23 = arith.constant 0 : index
      %c0_24 = arith.constant 0 : index
      %29 = vector.load %arg8[%c0_23, %c0_24] : memref<16x32xf32, #tpu.memory_space<vmem>>, vector<16x32xf32>
      tpu.vector_store %arg8[%c0_23, %c0_24], %28 {strides = array<i32>} : memref<16x32xf32, #tpu.memory_space<vmem>>, vector<16x32xf32>,
    } else {
    }
    return
  }
  func.func @transform_0(%arg0: i32, %arg1: i32) -> (i32, i32) {
    %c0_i32 = arith.constant 0 : i32
    %c0_i32_0 = arith.constant 0 : i32
    return %arg0, %c0_i32 : i32, i32
  }
  func.func @transform_1(%arg0: i32, %arg1: i32) -> (i32, i32) {
    %c0_i32 = arith.constant 0 : i32
    return %arg0, %arg1 : i32, i32
  }
  func.func @transform_2(%arg0: i32, %arg1: i32) -> (i32, i32) {
    %c0_i32 = arith.constant 0 : i32
    %c0_i32_0 = arith.constant 0 : i32
    return %c0_i32, %arg1 : i32, i32
  }
  func.func @transform_3(%arg0: i32, %arg1: i32) -> (i32, i32) {
    %c0_i32 = arith.constant 0 : i32
    %c0_i32_0 = arith.constant 0 : i32
    return %c0_i32, %arg1 : i32, i32
  }
  func.func @transform_4(%arg0: i32, %arg1: i32) -> (i32, i32) {
    %c0_i32 = arith.constant 0 : i32
    %c0_i32_0 = arith.constant 0 : i32
    return %arg1, %c0_i32 : i32, i32
  }
  func.func @transform_5(%arg0: i32, %arg1: i32) -> (i32, i32) {
    %c0_i32 = arith.constant 0 : i32
    %c0_i32_0 = arith.constant 0 : i32
    %c0_i32_1 = arith.constant 0 : i32
    return %c0_i32, %c0_i32_0 : i32, i32
  }
  func.func @transform_6(%arg0: i32, %arg1: i32) -> (i32, i32) {
    %c0_i32 = arith.constant 0 : i32
    %c0_i32_0 = arith.constant 0 : i32
    return %arg0, %c0_i32 : i32, i32
  }
}

</mosaic_0001>

<bundles_post_ra>
// kernel: tpu_custom_call.1
= control target key start
LH: loop header
LB: loop body
LE: loop exit
PB: predicated region body
PF: predicated region fallthrough
CT: control target
= control target key end

     0   :  { %s327_s0 = inlined_call_operand.vmem [shape: bf16[16,32], index: 0, kind: input, shape index: {}]   ;;  %s328_s1 = inlined_call_operand.vmem [shape: bf16[16,64], index: 1, kind: input, shape index: {}]   ;;  %s329_s2 = inlined_call_operand.vmem [shape: bf16[32,64], index: 2, kind: input, shape index: {}]   ;;  %s330_s3 = inlined_call_operand.vmem [shape: f32[1,64], index: 3, kind: input, shape index: {}]   ;;  %s331_s4 = inlined_call_operand.vmem [shape: bf16[64,32], index: 4, kind: input, shape index: {}]   ;;  %s332_s5 = inlined_call_operand.vmem [shape: f32[1,32], index: 5, kind: input, shape index: {}]   ;;  %s333_s6 = inlined_call_operand.hbm [shape: f32[16,32], index: 6, kind: output, shape index: {}]  }
   0x1   :  { %v207_v0 = vld [vmem:[%s329_s2 + $0x8] sm:$0xff] }
   0x2   :  { %11 = vsyncpa [#allocation4], 0  ;;  %69 = vmatpush.bf16.msra.mxu0 %v207_v0  ;;  %v206_v1 = vld [vmem:[%s329_s2] sm:$0xff]  ;;  %vm29_vm0 = vcmask 261120   ;;  %v211_v3 = vld [vmem:[%s331_s4 + $0x18] sm:$0xff]  ;;  %v248_v7 = vmov 0.0  }
   0x3   :  { %v205_v2 = vld [vmem:[%s327_s0] sm:$0xff]  ;;  %130 = vmatpush.bf16.msra.mxu1 %v211_v3  ;;  %v210_v4 = vld [vmem:[%s331_s4 + $0x10] sm:$0xff]  ;;  %v209_v5 = vld [vmem:[%s331_s4 + $0x8] sm:$0xff]  ;;  %30 = vst.msk [vmem:[#allocation2] sm:$0xff] %vm29_vm0, %v248_v7  ;;  %vm122_vm1 = vcmask 523264   ;;  %s163_s16 = sshll.u32 %s333_s6, 4  ;;  %s164_s16 = int_to_ptr.hbm [resolvable:$true] %s163_s16 }
   0x4   :  { %v208_v6 = vld [vmem:[%s331_s4] sm:$0xff]  ;;  %31 = vst.msk [vmem:[#allocation2 + $0x8] sm:$0xff] %vm29_vm0, %v248_v7  ;;  %s249_s4 = smov [#allocation3]   ;;  %s251_s17 = smov 8  }
   0x5   :  { %v220_v9 = vld [vmem:[%s330_s3] ss:$0 sm:$0xff]  ;;  %s161_s13 = sshll.u32 %s249_s4, 4  ;;  %s162_s13 = int_to_ptr.vmem [resolvable:$true] %s161_s13 }
   0x6   :  { %70 = vmatpush.bf16.msra.mxu0 %v206_v1  ;;  %v213_v10 = vld [vmem:[%s328_s1] sm:$0xff]  }
   0x7   :  { %131 = vmatpush.bf16.msra.mxu1 %v210_v4  ;;  %v214_v12 = vunpack.c.l.bf16 %v213_v10  ;;  %v215_v13 = vunpack.c.h.bf16 %v213_v10  ;;  %v221_v27 = vld [vmem:[%s332_s5] ss:$0 sm:$0xff]  ;;  %s250_s5 = smov 128  }
   0x9   :  { %187 = vmatmul.msk.bf16.vlgmr.msra.gmra.mxu0 %vm29_vm0, %v205_v2  ;;  %v83_v16 = vmul.f32 1.1111112, %v214_v12  ;;  %v84_v18 = vmul.f32 1.1111112, %v215_v13 }
   0xa   :  { %v87_v23 = vld [vmem:[#allocation2] sm:$0xff] }
   0xb   :  { %132 = vmatpush.bf16.msra.mxu1 %v209_v5  ;;  %v88_v26 = vld [vmem:[#allocation2 + $0x8] sm:$0xff] }
   0xf   :  { %133 = vmatpush.bf16.msra.mxu1 %v208_v6 }
  0x86   :  { %v72_v8 = vpop.f32.mrf.mxu0 }
  0x87   :  { %v73_v11 = vadd.f32 %v220_v9, %v72_v8 }
  0x89   :  { %v77_v15 = vmax.f32 %v73_v11, 0.0 }
  0x8b   :  { %v85_v20 = vmul.f32 %v83_v16, %v77_v15 }
  0x8e   :  { %v74_v14 = vpop.f32.mrf.mxu0 }
  0x8f   :  { %v75_v17 = vadd.f32 %v220_v9, %v74_v14 }
  0x91   :  { %v78_v19 = vmax.f32 %v75_v17, 0.0 }
  0x93   :  { %v86_v21 = vmul.f32 %v84_v18, %v78_v19 }
  0x95   :  { %v89_v22 = vpack.c.bf16 %v86_v21, %v85_v20 }
  0x97   :  { %204 = vmatmul.msk.bf16.vlgmr.msra.gmra.mxu1 %vm122_vm1, %v89_v22 }
 0x114   :  { %v135_v24 = vpop.f32.mrf.mxu1 }
 0x115   :  { %v140_v25 = vadd.f32 %v135_v24, %v87_v23 }
 0x117   :  { %142 = vst.msk [vmem:[#allocation2] sm:$0xff] %vm29_vm0, %v140_v25 }
 0x11c   :  { %v137_v28 = vpop.f32.mrf.mxu1 }
 0x11d   :  { %v141_v29 = vadd.f32 %v137_v28, %v88_v26 }
 0x11e   :  { %v147_v30 = vld [vmem:[#allocation2] sm:$0xff] }
 0x11f   :  { %143 = vst.msk [vmem:[#allocation2 + $0x8] sm:$0xff] %vm29_vm0, %v141_v29  ;;  %v153_v31 = vadd.f32 %v221_v27, %v147_v30 }
 0x121   :  { %155 = vst.msk [vmem:[#allocation3] sm:$0xff] %vm29_vm0, %v153_v31 }
 0x126   :  { %v148_v32 = vld [vmem:[#allocation2 + $0x8] sm:$0xff] }
 0x127   :  { %v154_v33 = vadd.f32 %v221_v27, %v148_v32 }
 0x129   :  { %156 = vst.msk [vmem:[#allocation3 + $0x8] sm:$0xff] %vm29_vm0, %v154_v33 }
 0x12a   :  { %169 = dma.vmem_to_hbm [thread:$0]  %s162_s13, 256, %s164_s16, [#allocation4], %s250_s5, %s250_s5, %s251_s17  }
 0x12b   :  { %246 = dma.done.wait [#allocation4], 256  }
 0x12c   :  { %247 = vsyncadd [#allocation4], 4294967040 }
 0x12d   :  { %174 = vsyncpa [#allocation4], 1 }

</bundles_post_ra>
